<compile_context>
chip_gen: v5e
topology: v5e:2x2
jax: 0.10.0
libtpu: 0.0.40
codegen_flags: <defaults>
</compile_context>

<pallas_src>
import math

import jax
import jax.numpy as jnp
from jax import lax
from jax.experimental import pallas as pl
from jax.experimental.pallas import tpu as pltpu


_INV_SQRT_2 = 1.0 / math.sqrt(2.0)
_SQRT_2_OVER_PI = math.sqrt(2.0 / math.pi)


def _gelu(x, approximate=False):
    if approximate:
        # tanh approximation: moves transcendental cost from the saturated VALU
        # (erf polynomial) to the otherwise-idle EUP (native tanh).
        x3 = x * x * x
        return 0.5 * x * (1.0 + jnp.tanh(_SQRT_2_OVER_PI * (x + 0.044715 * x3)))
    # PyTorch F.gelu default is the exact erf formulation.
    return 0.5 * x * (1.0 + lax.erf(x * _INV_SQRT_2))


def _make_kernel(approximate):
    def enhance_kernel(x_ref, w1t_ref, b1_ref, w2t_ref, b2_ref, o_ref):
        # x_ref  : (C_in, TL)    VMEM tile, L on the lane axis.
        # w1t_ref: (C_mid, C_in) VMEM   b1_ref: (C_mid, 1) VMEM
        # w2t_ref: (C_out, C_mid) VMEM  b2_ref: (C_out, 1) VMEM
        # o_ref  : (C_out, TL)   VMEM tile.
        x = _gelu(x_ref[...], approximate)                       # dense (C_in, TL)

        # Pointwise conv 1 on the MXU: (C_mid, C_in) @ (C_in, TL).
        h = jnp.dot(w1t_ref[...], x, preferred_element_type=jnp.float32)
        h = _gelu(h + b1_ref[...], approximate)                  # dense (C_mid, TL)

        # TODO(synk): nn.Dropout is identity at inference; training-mode dropout
        # (pltpu.prng_random_bits mask) is intentionally omitted.

        # Pointwise conv 2 on the MXU: (C_out, C_mid) @ (C_mid, TL).
        y = jnp.dot(w2t_ref[...], h, preferred_element_type=jnp.float32)
        o_ref[...] = (y + b2_ref[...]).astype(o_ref.dtype)       # dense store
    return enhance_kernel


def enhance_layers_forward(x_ncl, w1, b1, w2, b2, *,
                           max_lane_tile=64 * 1024,
                           approximate_gelu=False):
    """x_ncl: (B, C_in, L) float32 (PyTorch Conv1d layout). Returns (B, C_out, L)."""
    B, C_in, L = x_ncl.shape
    C_mid = w1.shape[1]
    C_out = w2.shape[1]

    def round_up(a, m):
        return (a + m - 1) // m * m

    # Lane tile: multiple of 128, as large as max_lane_tile allows.  Pad L up to
    # a multiple of the tile so every block is full-width (no masked stores, no
    # unbounded full-L fallback tile).
    tl = min(round_up(L, 128), max_lane_tile)
    L_pad = round_up(L, tl)
    x_in = x_ncl if L_pad == L else jnp.pad(x_ncl, ((0, 0), (0, 0), (0, L_pad - L)))

    # Pre-transpose tiny weights so the kernel dots are (out, in) @ (in, TL);
    # biases as lane-broadcastable columns.
    w1_t = jnp.transpose(w1)            # (C_mid, C_in)
    w2_t = jnp.transpose(w2)            # (C_out, C_mid)
    b1_c = b1.reshape(C_mid, 1)
    b2_c = b2.reshape(C_out, 1)

    grid = (B, L_pad // tl)

    out = pl.pallas_call(
        _make_kernel(approximate_gelu),
        out_shape=jax.ShapeDtypeStruct((B, C_out, L_pad), x_ncl.dtype),
        grid_spec=pltpu.PrefetchScalarGridSpec(
            num_scalar_prefetch=0,
            grid=grid,
            in_specs=[
                # (None, C_in, tl): batch dim squeezed, C on sublanes, L on lanes.
                pl.BlockSpec((None, C_in, tl), lambda b, l: (b, 0, l)),
                # Tiny weights / biases: full-extent VMEM blocks (a few KiB).
                pl.BlockSpec((C_mid, C_in), lambda b, l: (0, 0)),
                pl.BlockSpec((C_mid, 1), lambda b, l: (0, 0)),
                pl.BlockSpec((C_out, C_mid), lambda b, l: (0, 0)),
                pl.BlockSpec((C_out, 1), lambda b, l: (0, 0)),
            ],
            out_specs=pl.BlockSpec((None, C_out, tl), lambda b, l: (b, 0, l)),
        ),
        compiler_params=pltpu.CompilerParams(
            # Both grid axes independent -> megacore sharding on v7x.
            dimension_semantics=("parallel", "parallel"),
            # Explicit limit so large tiles work on v5e (16 MiB default scoped
            # VMEM) while staying safely under v7x's 64 MiB physical VMEM.
            vmem_limit_bytes=48 * 1024 * 1024,
        ),
    )(x_in, w1_t, b1_c, w2_t, b2_c)

    if L_pad != L:
        out = out[:, :, :L]
    return out


def _reference_forward(x_ncl, w1, b1, w2, b2):
    """Pure-JAX reference matching PyTorch semantics (eval mode)."""
    x = _gelu(x_ncl)
    # conv1d k=1: out[b,o,l] = sum_i W[i,o] x[b,i,l] + bias[o]
    h = jnp.einsum('io,bil->bol', w1, x) + b1[None, :, None]
    h = _gelu(h)
    y = jnp.einsum('io,bil->bol', w2, h) + b2[None, :, None]
    return y


if __name__ == "__main__":
    # Synthetic "params": num_variates=4, num_dilated_layers=3 -> C_mid=8,
    # features='M' -> out_features = num_variates = 4, activation='gelu'.
    B, C_in, L = 2, 4, 16
    C_mid = 2 ** 3
    C_out = C_in  # features == 'M'

    key = jax.random.PRNGKey(0)
    k_x, k_w1, k_b1, k_w2, k_b2 = jax.random.split(key, 5)

    x = jax.random.normal(k_x, (B, C_in, L), dtype=jnp.float32)

    # Deterministic parameter init (PyTorch-like uniform bounds for k=1 conv).
    bound1 = 1.0 / math.sqrt(C_in)
    w1 = jax.random.uniform(k_w1, (C_in, C_mid), jnp.float32, -bound1, bound1)
    b1 = jax.random.uniform(k_b1, (C_mid,), jnp.float32, -bound1, bound1)
    bound2 = 1.0 / math.sqrt(C_mid)
    w2 = jax.random.uniform(k_w2, (C_mid, C_out), jnp.float32, -bound2, bound2)
    b2 = jax.random.uniform(k_b2, (C_out,), jnp.float32, -bound2, bound2)

    y = enhance_layers_forward(x, w1, b1, w2, b2)
    y = jax.block_until_ready(y)

    y_ref = _reference_forward(x, w1, b1, w2, b2)
    assert y.shape == (B, C_out, L), y.shape
    assert jnp.allclose(y, y_ref, atol=1e-5, rtol=1e-5), "mismatch vs reference"

    print("KERNEL_OK")
</pallas_src>

<mosaic_0001>
module attributes {stable_mosaic.version = 11 : i64} {
  func.func @enhance_kernel(%arg0: i32, %arg1: i32, %arg2: memref<1x4x128xf32, #tpu.memory_space<vmem>>, %arg3: memref<8x4xf32, #tpu.memory_space<vmem>>, %arg4: memref<8x1xf32, #tpu.memory_space<vmem>>, %arg5: memref<4x8xf32, #tpu.memory_space<vmem>>, %arg6: memref<4x1xf32, #tpu.memory_space<vmem>>, %arg7: memref<1x4x128xf32, #tpu.memory_space<vmem>>) attributes {dimension_semantics = [#tpu.dimension_semantics<parallel>, #tpu.dimension_semantics<parallel>], iteration_bounds = array<i64: 2, 1>, scalar_prefetch = 0 : i64, scratch_operands = 0 : i64, tpu.core_type = #tpu.core_type<tc>, window_params = [{transform_indices = @transform_0, window_bounds = array<i64: 1, 4, 128>}, {pipeline_mode = #tpu.pipeline_mode<synchronous>, transform_indices = @transform_1, window_bounds = array<i64: 8, 4>}, {pipeline_mode = #tpu.pipeline_mode<synchronous>, transform_indices = @transform_2, window_bounds = array<i64: 8, 1>}, {pipeline_mode = #tpu.pipeline_mode<synchronous>, transform_indices = @transform_3, window_bounds = array<i64: 4, 8>}, {pipeline_mode = #tpu.pipeline_mode<synchronous>, transform_indices = @transform_4, window_bounds = array<i64: 4, 1>}, {transform_indices = @transform_5, window_bounds = array<i64: 1, 4, 128>}]} {
    %c0 = arith.constant 0 : index
    %c0_0 = arith.constant 0 : index
    %c0_1 = arith.constant 0 : index
    %0 = vector.load %arg2[%c0, %c0_0, %c0_1] : memref<1x4x128xf32, #tpu.memory_space<vmem>>, vector<1x4x128xf32>
    %1 = vector.shape_cast %0 : vector<1x4x128xf32> to vector<4x128xf32>
    %cst = arith.constant 5.000000e-01 : f32
    %2 = vector.broadcast %cst : f32 to vector<4x128xf32>
    %3 = arith.mulf %2, %1 : vector<4x128xf32>
    %cst_2 = arith.constant 0.707106769 : f32
    %4 = vector.broadcast %cst_2 : f32 to vector<4x128xf32>
    %5 = arith.mulf %1, %4 : vector<4x128xf32>
    %6 = math.erf %5 : vector<4x128xf32>
    %cst_3 = arith.constant 1.000000e+00 : f32
    %7 = vector.broadcast %cst_3 : f32 to vector<4x128xf32>
    %8 = arith.addf %7, %6 : vector<4x128xf32>
    %9 = arith.mulf %3, %8 : vector<4x128xf32>
    %c0_4 = arith.constant 0 : index
    %c0_5 = arith.constant 0 : index
    %10 = vector.load %arg3[%c0_4, %c0_5] : memref<8x4xf32, #tpu.memory_space<vmem>>, vector<8x4xf32>
    %cst_6 = arith.constant dense<0.000000e+00> : vector<8x128xf32>
    %11 = tpu.matmul %10, %9, %cst_6 {dimension_numbers = #tpu.dot_dimension_numbers<[1], [0], [0], [1], [0, 0, 1, 1], [], []>} : vector<8x4xf32>, vector<4x128xf32>, vector<8x128xf32> -> vector<8x128xf32>
    %c0_7 = arith.constant 0 : index
    %c0_8 = arith.constant 0 : index
    %12 = vector.load %arg4[%c0_7, %c0_8] : memref<8x1xf32, #tpu.memory_space<vmem>>, vector<8x1xf32>
    %13 = vector.broadcast %12 : vector<8x1xf32> to vector<8x128xf32>
    %14 = arith.addf %11, %13 : vector<8x128xf32>
    %cst_9 = arith.constant 5.000000e-01 : f32
    %15 = vector.broadcast %cst_9 : f32 to vector<8x128xf32>
    %16 = arith.mulf %15, %14 : vector<8x128xf32>
    %cst_10 = arith.constant 0.707106769 : f32
    %17 = vector.broadcast %cst_10 : f32 to vector<8x128xf32>
    %18 = arith.mulf %14, %17 : vector<8x128xf32>
    %19 = math.erf %18 : vector<8x128xf32>
    %cst_11 = arith.constant 1.000000e+00 : f32
    %20 = vector.broadcast %cst_11 : f32 to vector<8x128xf32>
    %21 = arith.addf %20, %19 : vector<8x128xf32>
    %22 = arith.mulf %16, %21 : vector<8x128xf32>
    %c0_12 = arith.constant 0 : index
    %c0_13 = arith.constant 0 : index
    %23 = vector.load %arg5[%c0_12, %c0_13] : memref<4x8xf32, #tpu.memory_space<vmem>>, vector<4x8xf32>
    %cst_14 = arith.constant dense<0.000000e+00> : vector<4x128xf32>
    %24 = tpu.matmul %23, %22, %cst_14 {dimension_numbers = #tpu.dot_dimension_numbers<[1], [0], [0], [1], [0, 0, 1, 1], [], []>} : vector<4x8xf32>, vector<8x128xf32>, vector<4x128xf32> -> vector<4x128xf32>
    %c0_15 = arith.constant 0 : index
    %c0_16 = arith.constant 0 : index
    %25 = vector.load %arg6[%c0_15, %c0_16] : memref<4x1xf32, #tpu.memory_space<vmem>>, vector<4x1xf32>
    %26 = vector.broadcast %25 : vector<4x1xf32> to vector<4x128xf32>
    %27 = arith.addf %24, %26 : vector<4x128xf32>
    %c0_17 = arith.constant 0 : index
    %c0_18 = arith.constant 0 : index
    %c0_19 = arith.constant 0 : index
    %28 = vector.load %arg7[%c0_17, %c0_18, %c0_19] : memref<1x4x128xf32, #tpu.memory_space<vmem>>, vector<1x4x128xf32>
    %29 = vector.shape_cast %28 : vector<1x4x128xf32> to vector<4x128xf32>
    %30 = vector.shape_cast %27 : vector<4x128xf32> to vector<1x4x128xf32>
    tpu.vector_store %arg7[%c0_17, %c0_18, %c0_19], %30 {strides = array<i32>} : memref<1x4x128xf32, #tpu.memory_space<vmem>>, vector<1x4x128xf32>,
    return
  }
  func.func @transform_0(%arg0: i32, %arg1: i32) -> (i32, i32, i32) {
    %c0_i32 = arith.constant 0 : i32
    %c0_i32_0 = arith.constant 0 : i32
    return %arg0, %c0_i32, %arg1 : i32, i32, i32
  }
  func.func @transform_1(%arg0: i32, %arg1: i32) -> (i32, i32) {
    %c0_i32 = arith.constant 0 : i32
    %c0_i32_0 = arith.constant 0 : i32
    %c0_i32_1 = arith.constant 0 : i32
    return %c0_i32, %c0_i32_0 : i32, i32
  }
  func.func @transform_2(%arg0: i32, %arg1: i32) -> (i32, i32) {
    %c0_i32 = arith.constant 0 : i32
    %c0_i32_0 = arith.constant 0 : i32
    %c0_i32_1 = arith.constant 0 : i32
    return %c0_i32, %c0_i32_0 : i32, i32
  }
  func.func @transform_3(%arg0: i32, %arg1: i32) -> (i32, i32) {
    %c0_i32 = arith.constant 0 : i32
    %c0_i32_0 = arith.constant 0 : i32
    %c0_i32_1 = arith.constant 0 : i32
    return %c0_i32, %c0_i32_0 : i32, i32
  }
  func.func @transform_4(%arg0: i32, %arg1: i32) -> (i32, i32) {
    %c0_i32 = arith.constant 0 : i32
    %c0_i32_0 = arith.constant 0 : i32
    %c0_i32_1 = arith.constant 0 : i32
    return %c0_i32, %c0_i32_0 : i32, i32
  }
  func.func @transform_5(%arg0: i32, %arg1: i32) -> (i32, i32, i32) {
    %c0_i32 = arith.constant 0 : i32
    %c0_i32_0 = arith.constant 0 : i32
    return %arg0, %c0_i32, %arg1 : i32, i32, i32
  }
}

</mosaic_0001>

<bundles_post_ra>
// kernel: tpu_custom_call.1
= control target key start
LH: loop header
LB: loop body
LE: loop exit
PB: predicated region body
PF: predicated region fallthrough
CT: control target
= control target key end

     0   :  { %10 = vsyncpa [#allocation3], 0  ;;  %s786_s0 = inlined_call_operand.vmem [shape: f32[2,4,128], index: 0, kind: input, shape index: {}]   ;;  %s787_s1 = inlined_call_operand.vmem [shape: f32[8,4], index: 1, kind: input, shape index: {}]   ;;  %s788_s2 = inlined_call_operand.vmem [shape: f32[8,1], index: 2, kind: input, shape index: {}]   ;;  %s789_s3 = inlined_call_operand.vmem [shape: f32[4,8], index: 3, kind: input, shape index: {}]   ;;  %s790_s4 = inlined_call_operand.vmem [shape: f32[4,1], index: 4, kind: input, shape index: {}]   ;;  %s791_s5 = inlined_call_operand.hbm [shape: f32[2,4,128], index: 5, kind: output, shape index: {}]  }
   0x1   :  { %12 = vsyncpa [#allocation3 + $0x1], 0  ;;  %s677_s18 = smov 0   ;;  %s679_s19 = smov 0  }
   0x2   :  { %s681_s20 = smov 0   ;;  %s683_s21 = smov 0  }
   0x3   :  { %s685_s22 = smov 0   ;;  %s687_s23 = smov 0  }
   0x4 LB: > { %s489_s24 = sadd.s32 4294967295, %s644_s23   ;;  %s490_s25 = sadd.s32 4294967294, %s644_s23   ;;  %s644_s23 = sphi %s687_s23, %s18_s23   ;;  %s640_s22 = sphi %s685_s22, %s798_s22   ;;  %s636_s21 = sphi %s683_s21, %s797_s21   ;;  %s632_s20 = sphi %s681_s20, %s796_s20   ;;  %s628_s19 = sphi %s679_s19, %s795_s19   ;;  %s624_s18 = sphi %s677_s18, %s794_s18  }
   0x5   : > { %s30_s26 = sadd.s32 1, %s640_s22  ;;  %s151_s27 = sadd.s32 1, %s632_s20 }
   0x6   : > { %p32_p0 = scmp.ge.s32.totalorder %s30_s26, 2  ;;  %p161_p1 = scmp.ne.s32.totalorder %s632_s20, %s628_s19 }
   0x7   : > { %p162_p2 = scmp.eq.s32.totalorder %s489_s24, 1  ;;  %p167_p3 = scmp.ne.s32.totalorder %s628_s19, %s624_s18 }
   0x8   : > { %s800_s26 = smov (%p32_p0, %s30_s26), 0  ;;  %p168_p5 = scmp.eq.s32.totalorder %s490_s25, 1 }
   0x9   : > { %p717_p4 = por %p162_p2, %p161_p1  ;;  %s146_s29 = ssub.s32 %s640_s22, %s800_s26 }
   0xa   : > { %p493_p6 = scmp.ge.s32.totalorder %s644_s23, 1  ;;  %p149_p7 = scmp.eq.s32.totalorder %s146_s29, 0 }
   0xb   : > { %p724_p8 = por %p168_p5, %p167_p3  ;;  %p208_p9 = scmp.lt.s32.totalorder %s644_s23, 3 }
   0xc   : > { %s730_s6 = scalar_select %p149_p7, %s632_s20, %s151_s27  }
   0xd   : > { %p209_p10 = pnand %p493_p6, %p208_p9 }
   0xe   : > { %p238_p11 = scmp.lt.s32.totalorder (!%p209_p10), %s636_s21, 1  ;;  %s235_s27 = sand.u32 (!%p209_p10), 1, %s628_s19  }
   0xf   : > { %212 = sbr.rel (%p209_p10) target bundleno = 388 (0x184), region = 40  ;;  %s494_s29 = sshll.u32 (!%p209_p10), %s235_s27, 2 }
  0x10   : > { %s402_s14 = scalar_lea.sflag (!%p209_p10), [#allocation3], %s235_s27  ;;  %s586_s24 = scalar_lea.hbm (!%p209_p10), %s791_s5, 8 }
  0x14   : > { %s239_s7 = scalar_select %p238_p11, %s636_s21, 1  ;;  %v291_v18 = vld [vmem:[%s788_s2] sm:$0xff]  ;;  %v646_v19 = vmov 0   ;;  %vm301_vm4 = vcmask 1043456   ;;  %vm297_vm5 = vcmask 31744   ;;  %vm376_vm10 = vcmask 64512  }
  0x15   : > { %561 = vset.pattern.permute.xlu0 %v646_v19  ;;  %v370_v24 = vld [vmem:[%s790_s4] sm:$0xf] }
  0x16   : > { %s495_s8 = sshll.u32 %s239_s7, 2  ;;  %294 = vperm.xlu0 %561, %v291_v18   ;;  %v290_v43 = vld [vmem:[%s787_s1] sm:$0xff]  ;;  %s502_s7 = sshll.u32 %s636_s21, 2 }
  0x17   : > { %s244_s11 = scalar_lea.vmem %s786_s0, %s495_s8  ;;  %s413_s10 = scalar_lea.hbm %s791_s5, %s502_s7 }
  0x18   : > { %v245_v0 = vld [vmem:[%s244_s11] sm:$0xf]  ;;  %s237_s11 = scalar_lea.vmem [#allocation2], %s494_s29  ;;  %s417_s13 = sshll.u32 %s413_s10, 4  ;;  %s418_s13 = int_to_ptr.hbm [resolvable:$true] %s417_s13 }
  0x19   : > { %v247_v1 = vmul.f32 0.70710677, %v245_v0  ;;  %v246_v39 = vmul.f32 0.5, %v245_v0  ;;  %s415_s12 = sshll.u32 %s237_s11, 4  ;;  %s580_s15 = sshra.s32 %s418_s13, 4  ;;  %s416_s12 = int_to_ptr.vmem [resolvable:$true] %s415_s12  ;;  %s581_s15 = int_to_ptr.hbm [resolvable:$true] %s580_s15 }
  0x1a   : > { %s582_s16 = scalar_lea.hbm %s581_s15, 4  ;;  %p587_p1 = scmp.lt.s32.totalorder %s581_s15, %s791_s5 }
  0x1b   : > { %v248_v2 = vmul.f32 %v247_v1, %v247_v1  ;;  %p583_p12 = scmp.ne.s32.totalorder %s581_s15, %s582_s16  ;;  %p588_p2 = scmp.lt.s32.totalorder %s586_s24, %s582_s16 }
  0x1d   : > { %v249_v3 = vmin.f32 %v248_v2, 16.0  ;;  %p584_p13 = pnand %p583_p12, %p717_p4  ;;  %p589_p3 = por %p588_p2, %p587_p1 }
  0x1e   : > { %373 = vperm.xlu0 %561, %v370_v24  }
  0x1f   : > { %v250_v4 = vmul.f32 2.1237322e-06, %v249_v3  ;;  %v261_v5 = vmul.f32 3.8918573e-05, %v249_v3  ;;  %p585_p0 = pneg %p584_p13 }
  0x21   : > { %v251_v6 = vadd.f32 0.00028619796, %v250_v4  ;;  %v262_v7 = vadd.f32 0.001143296, %v261_v5  ;;  %p590_p5 = pnand %p589_p3, %p585_p0 }
  0x23   : > { %v252_v8 = vmul.f32 %v251_v6, %v249_v3  ;;  %v263_v9 = vmul.f32 %v262_v7, %v249_v3 }
  0x25   : > { %v253_v10 = vadd.f32 0.0036580483, %v252_v8  ;;  %v264_v11 = vadd.f32 0.014752088, %v263_v9 }
  0x27   : > { %v254_v12 = vmul.f32 %v253_v10, %v249_v3  ;;  %v265_v13 = vmul.f32 %v264_v11, %v249_v3 }
  0x29   : > { %v266_v14 = vadd.f32 0.112945676, %v265_v13  ;;  %v255_v15 = vadd.f32 0.05243302, %v254_v12 }
  0x2b   : > { %v267_v16 = vmul.f32 %v266_v14, %v249_v3  ;;  %v256_v20 = vmul.f32 %v255_v15, %v249_v3 }
  0x2d   : > { %v268_v17 = vadd.f32 0.4994258, %v267_v16  ;;  %v257_v23 = vadd.f32 0.18741608, %v256_v20 }
  0x2f   : > { %v269_v21 = vmul.f32 %v268_v17, %v249_v3  ;;  %v258_v25 = vmul.f32 %v257_v23, %v249_v3 }
  0x31   : > { %v270_v22 = vadd.f32 1.0, %v269_v21  ;;  %v259_v28 = vadd.f32 1.1283791, %v258_v25 }
  0x33   : > { %562 = vrcp.f32 %v270_v22  ;;  %v282_v29 = vand.u32 2147483648, %v270_v22  ;;  %vm276_vm0 = vweird.f32 %v270_v22  ;;  %v280_v31 = vand.u32 2147483647, %v270_v22 }
  0x34   : > { %v260_v34 = vmul.f32 %v259_v28, %v247_v1 }
  0x35   : > { %v283_v33 = vor.u32 1.1754944e-38, %v282_v29  ;;  %vm281_vm3 = vcmp.eq.f32.partialorder %v280_v31, 8.507059e+37 }
  0x39   : > { %v563_v26 = vpop.eup %562 }
  0x3a   : > { %v272_v27 = vmul.f32 %v563_v26, %v270_v22  ;;  %vm277_vm1 = vweird.f32 %v563_v26  ;;  %v369_v22 = vld [vmem:[%s789_s3] sm:$0xf] }
  0x3b   : > { %vm278_vm2 = vmor %vm276_vm0, %vm277_vm1 }
  0x3c   : > { %v273_v30 = vsub.f32 1.0, %v272_v27 }
  0x3e   : > { %v274_v32 = vmul.f32 %v563_v26, %v273_v30 }
  0x40   : > { %v275_v35 = vadd.f32 %v563_v26, %v274_v32 }
  0x42   : > { %v279_v36 = vsel %vm278_vm2, %v563_v26, %v275_v35 }
  0x43   : > { %v284_v37 = vsel %vm281_vm3, %v283_v33, %v279_v36 }
  0x44   : > { %v285_v38 = vmul.f32 %v284_v37, %v260_v34 }
  0x46   : > { %v496_v40 = vclamps-f32 %v285_v38, 1.0 }
  0x48   : > { %v288_v41 = vadd.f32 1.0, %v496_v40 }
  0x4a   : > { %v289_v42 = vmul.f32 %v288_v41, %v246_v39 }
  0x4c   : > { %497 = vmatpush.msk.msra.mxu0 %vm301_vm4, %v289_v42 }
  0x4d   : > { %498 = vmatmul.msk.f32.vlgmr.msra.gmra.mxu0 %vm297_vm5, %v290_v43 }
  0x88   : > { %v295_v44 = vpop.permute.xlu0 %294 }
  0x90   : > { %v374_v23 = vpop.permute.xlu0 %373 }
  0xca   : > { %v322_v45 = vpop.f32.mrf.mxu0 }
  0xcb   : > { %v323_v46 = vadd.f32 %v322_v45, %v295_v44 }
  0xcd   : > { %v326_v47 = vmul.f32 0.70710677, %v323_v46  ;;  %v325_v19 = vmul.f32 0.5, %v323_v46 }
  0xcf   : > { %v327_v48 = vmul.f32 %v326_v47, %v326_v47 }
  0xd1   : > { %v328_v49 = vmin.f32 %v327_v48, 16.0 }
  0xd3   : > { %v329_v50 = vmul.f32 2.1237322e-06, %v328_v49  ;;  %v340_v51 = vmul.f32 3.8918573e-05, %v328_v49 }
  0xd5   : > { %v330_v52 = vadd.f32 0.00028619796, %v329_v50  ;;  %v341_v53 = vadd.f32 0.001143296, %v340_v51 }
  0xd7   : > { %v331_v54 = vmul.f32 %v330_v52, %v328_v49  ;;  %v342_v55 = vmul.f32 %v341_v53, %v328_v49 }
  0xd9   : > { %v343_v56 = vadd.f32 0.014752088, %v342_v55  ;;  %v332_v57 = vadd.f32 0.0036580483, %v331_v54 }
  0xdb   : > { %v344_v58 = vmul.f32 %v343_v56, %v328_v49  ;;  %v333_v60 = vmul.f32 %v332_v57, %v328_v49 }
  0xdd   : > { %v345_v59 = vadd.f32 0.112945676, %v344_v58  ;;  %v334_v63 = vadd.f32 0.05243302, %v333_v60 }
  0xdf   : > { %v346_v61 = vmul.f32 %v345_v59, %v328_v49  ;;  %v335_v2 = vmul.f32 %v334_v63, %v328_v49 }
  0xe1   : > { %v347_v62 = vadd.f32 0.4994258, %v346_v61  ;;  %v336_v3 = vadd.f32 0.18741608, %v335_v2 }
  0xe3   : > { %v348_v0 = vmul.f32 %v347_v62, %v328_v49  ;;  %v337_v5 = vmul.f32 %v336_v3, %v328_v49 }
  0xe5   : > { %v349_v1 = vadd.f32 1.0, %v348_v0  ;;  %v338_v9 = vadd.f32 1.1283791, %v337_v5 }
  0xe7   : > { %564 = vrcp.f32 %v349_v1  ;;  %v361_v8 = vand.u32 2147483648, %v349_v1  ;;  %v359_v11 = vand.u32 2147483647, %v349_v1  ;;  %vm355_vm7 = vweird.f32 %v349_v1 }
  0xe8   : > { %v339_v14 = vmul.f32 %v338_v9, %v326_v47 }
  0xe9   : > { %v362_v13 = vor.u32 1.1754944e-38, %v361_v8  ;;  %vm360_vm9 = vcmp.eq.f32.partialorder %v359_v11, 8.507059e+37 }
  0xed   : > { %v565_v4 = vpop.eup %564 }
  0xee   : > { %v351_v6 = vmul.f32 %v565_v4, %v349_v1  ;;  %vm356_vm6 = vweird.f32 %v565_v4 }
  0xef   : > { %vm357_vm8 = vmor %vm355_vm7, %vm356_vm6 }
  0xf0   : > { %v352_v7 = vsub.f32 1.0, %v351_v6 }
  0xf2   : > { %v353_v10 = vmul.f32 %v565_v4, %v352_v7 }
  0xf4   : > { %v354_v12 = vadd.f32 %v565_v4, %v353_v10 }
  0xf6   : > { %v358_v15 = vsel %vm357_vm8, %v565_v4, %v354_v12 }
  0xf7   : > { %v363_v16 = vsel %vm360_vm9, %v362_v13, %v358_v15 }
  0xf8   : > { %v364_v17 = vmul.f32 %v363_v16, %v339_v14 }
  0xfa   : > { %v499_v18 = vclamps-f32 %v364_v17, 1.0 }
  0xfc   : > { %v367_v20 = vadd.f32 1.0, %v499_v18 }
  0xfe   : > { %v368_v21 = vmul.f32 %v367_v20, %v325_v19 }
 0x100   : > { %395 = vmatpush.msra.mxu1 %v368_v21 }
 0x101   : > { %500 = vmatmul.msk.f32.vlgmr.msra.gmra.mxu1 %vm376_vm10, %v369_v22 }
 0x17e   : > { %v397_v24 = vpop.f32.mrf.mxu1 }
 0x17f   : > { %v398_v25 = vadd.f32 %v397_v24, %v374_v23 }
 0x181   : > { %400 = vst [vmem:[%s237_s11] sm:$0xf] %v398_v25 }
 0x182   : > { %593 = shalt.err (!%p590_p5)
}
 0x183   : > { %505 = dma.vmem_to_hbm [thread:$0]  (%p717_p4), %s416_s12, 64, %s418_s13, %s402_s14  }
 0x184 PF: > { %p511_p6 = scmp.ge.s32.totalorder %s644_s23, 2  ;;  %s429_s27 = sand.u32 1, %s624_s18  }
 0x185   : > { %s430_s7 = scalar_lea.sflag [#allocation3], %s429_s27 }
 0x186   : > { %p508_p7 = pnand %p511_p6, %p724_p8 }
 0x188   : > { %p509_p9 = pneg %p508_p7 }
 0x18a   : > { %619 = dma.done.wait (%p509_p9), %s430_s7, 64  }
 0x18b   : > { %621 = vsyncadd (%p509_p9), %s430_s7, 4294967232  ;;  %s18_s23 = sadd.s32 1, %s644_s23   ;;  %s794_s18 = smov %s628_s19 }
 0x18c   : > { %p15_p10 = scmp.ge.s32.totalorder %s18_s23, 4   ;;  %s795_s19 = smov %s632_s20 }
 0x18d   : > { %s796_s20 = smov %s730_s6  ;;  %s797_s21 = smov %s640_s22 }
 0x18e   : > { %s798_s22 = smov %s800_s26  ;;  %17 = sbr.rel (!%p15_p10) target bundleno = 4 (0x4), region = 75 }
 0x193   :  { %436 = vsyncpa [#allocation3], 1 }
 0x194   :  { %438 = vsyncpa [#allocation3 + $0x1], 1 }

</bundles_post_ra>
